<compile_context>
chip_gen: v5e
topology: v5e:2x2
jax: 0.10.0
libtpu: 0.0.40
codegen_flags: <defaults>
</compile_context>

<pallas_src>
import functools
import math

import jax
import jax.numpy as jnp
from jax.experimental import pallas as pl
from jax.experimental.pallas import tpu as pltpu


# ---------------------------------------------------------------------------
# Small helpers: tiling with padding, VMEM limit, single-buffered weight specs.
# ---------------------------------------------------------------------------
def _round_up(x, m):
    return ((x + m - 1) // m) * m


def _tile_and_pad(total, max_tile):
    """Return (tile, padded_total).

    If total <= max_tile the block is the full extent (always satisfies the
    (8,128) rule).  Otherwise pick an 8-aligned tile <= max_tile and pad the
    extent up to a multiple of it (callers slice the padding back off)."""
    if total <= max_tile:
        return total, total
    tile = max(8, (max_tile // 8) * 8)
    return tile, _round_up(total, tile)


def _vmem_limit():
    # 48 MiB is safe on every listed generation (v7x physical VMEM is 64 MiB);
    # v5e/v6e have 128 MiB physical, so allow a larger scoped budget there.
    try:
        kind = jax.devices()[0].device_kind.lower()
    except Exception:  # pragma: no cover
        kind = ""
    if "v5" in kind or "v6" in kind:
        return 96 * 1024 * 1024
    return 48 * 1024 * 1024


_SINGLE_BUFFER_OK = None


def _probe_single_buffer():
    """Check once whether pipeline_mode=pl.Buffered(1) is accepted end-to-end."""
    try:
        spec = pl.BlockSpec((8, 128), lambda i: (0, 0), pipeline_mode=pl.Buffered(1))

        def k(c_ref, x_ref, o_ref):
            o_ref[...] = x_ref[...] + c_ref[...]

        x = jnp.zeros((8, 128), jnp.float32)
        out = pl.pallas_call(
            k,
            out_shape=jax.ShapeDtypeStruct((8, 128), jnp.float32),
            grid=(1,),
            in_specs=[spec, pl.BlockSpec((8, 128), lambda i: (0, 0))],
            out_specs=pl.BlockSpec((8, 128), lambda i: (0, 0)),
        )(x, x)
        jax.block_until_ready(out)
        return True
    except Exception:
        return False


def _const_spec(block_shape, index_map):
    """BlockSpec for a grid-invariant operand: single pipeline buffer if supported."""
    global _SINGLE_BUFFER_OK
    if _SINGLE_BUFFER_OK is None:
        _SINGLE_BUFFER_OK = _probe_single_buffer()
    if _SINGLE_BUFFER_OK:
        return pl.BlockSpec(block_shape, index_map, pipeline_mode=pl.Buffered(1))
    return pl.BlockSpec(block_shape, index_map)


# ---------------------------------------------------------------------------
# Standalone BertLayerNorm kernel (the spec module).
# ---------------------------------------------------------------------------
def _layer_norm_kernel(x_ref, gamma_ref, beta_ref, out_ref, *, eps):
    x = x_ref[...].astype(jnp.float32)                      # (TM, D)
    u = jnp.mean(x, axis=-1, keepdims=True)
    diff = x - u
    s = jnp.mean(diff * diff, axis=-1, keepdims=True)       # biased variance (TF style)
    normed = diff * jax.lax.rsqrt(s + eps)                   # rsqrt -> EUP slot
    out = gamma_ref[...] * normed + beta_ref[...]
    out_ref[...] = out.astype(out_ref.dtype)


def bert_layer_norm(x, weight, bias, eps=1e-12, max_rows=1024):
    """x: (..., D) ; weight, bias: (D,). Matches torch BertLayerNorm.forward."""
    orig_shape = x.shape
    D = orig_shape[-1]
    R = int(math.prod(orig_shape[:-1]))
    x2 = x.reshape(R, D)

    TM, R_pad = _tile_and_pad(R, max_rows)
    if R_pad != R:
        x2 = jnp.pad(x2, ((0, R_pad - R), (0, 0)))           # padded rows sliced off below

    flops = 8 * R_pad * D
    bytes_acc = R_pad * D * x.dtype.itemsize * 2 + 2 * D * 4

    out = pl.pallas_call(
        functools.partial(_layer_norm_kernel, eps=eps),
        out_shape=jax.ShapeDtypeStruct((R_pad, D), x.dtype),
        grid_spec=pltpu.PrefetchScalarGridSpec(
            num_scalar_prefetch=0,
            grid=(R_pad // TM,),
            in_specs=[pl.BlockSpec((TM, D), lambda i: (i, 0)),
                      _const_spec((1, D), lambda i: (0, 0)),
                      _const_spec((1, D), lambda i: (0, 0))],
            out_specs=pl.BlockSpec((TM, D), lambda i: (i, 0)),
        ),
        compiler_params=pltpu.CompilerParams(
            dimension_semantics=("parallel",),
            vmem_limit_bytes=_vmem_limit()),
        cost_estimate=pl.CostEstimate(flops=flops, transcendentals=0,
                                      bytes_accessed=bytes_acc),
    )(x2, weight.reshape(1, D).astype(jnp.float32), bias.reshape(1, D).astype(jnp.float32))

    if R_pad != R:
        out = out[:R]
    return out.reshape(orig_shape)


# ---------------------------------------------------------------------------
# Kernel A: fused QKV projection (one (D, 3D) bf16 matmul, f32 accumulation).
# x arrives f32 and is cast to bf16 in VMEM (no wrapper-side cast pass).
# ---------------------------------------------------------------------------
def _qkv_kernel(x_ref, w_ref, b_ref, q_ref, k_ref, v_ref):
    x = x_ref[...].astype(jnp.bfloat16)                       # (TM, D)
    qkv = jnp.dot(x, w_ref[...],
                  preferred_element_type=jnp.float32) + b_ref[...]   # (TM, 3D) f32
    D = q_ref.shape[-1]
    q_ref[...] = qkv[:, 0 * D:1 * D].astype(q_ref.dtype)
    k_ref[...] = qkv[:, 1 * D:2 * D].astype(k_ref.dtype)
    v_ref[...] = qkv[:, 2 * D:3 * D].astype(v_ref.dtype)


# ---------------------------------------------------------------------------
# Kernel B: per-head attention -> (TQ, D) context scratch -> ONE K=D output
# matmul -> residual -> BertLayerNorm.  Tiled over the query dimension.
# q is pre-scaled by 1/sqrt(head_size) (folded into the weights at trace time).
# ---------------------------------------------------------------------------
def _attn_out_ln_kernel(q_ref, k_ref, v_ref, mask_ref, x_ref,
                        wo_ref, bo_ref, gamma_ref, beta_ref,
                        out_ref, ctx_ref, *, num_heads, head_size, eps):
    q = q_ref[0]                               # (TQ, D) bf16, pre-scaled
    k = k_ref[0]                               # (L,  D) bf16
    v = v_ref[0]                               # (L,  D) bf16
    x = x_ref[0].astype(jnp.float32)           # (TQ, D) f32 residual input

    # (1 - mask) * -10000.0, computed in VMEM from the f32 mask block.
    bias = (1.0 - mask_ref[0].astype(jnp.float32)) * (-10000.0)        # (TQ, L)

    for h in range(num_heads):                 # static loop; no head transposes
        sl = slice(h * head_size, (h + 1) * head_size)

        # scores_h: (TQ, L)  (contract on the head dim, no explicit transpose)
        scores = jax.lax.dot_general(q[:, sl], k[:, sl], (((1,), (1,)), ((), ())),
                                     preferred_element_type=jnp.float32)
        scores = scores + bias

        # numerically stable softmax; reciprocal on the EUP slot
        s_max = jnp.max(scores, axis=-1, keepdims=True)
        exp_s = jnp.exp(scores - s_max)
        denom = jnp.sum(exp_s, axis=-1, keepdims=True)
        probs = exp_s * pl.reciprocal(denom, approx=True)

        # context for this head, written into the (TQ, D) VMEM scratch
        ctx_h = jnp.dot(probs.astype(v.dtype), v[:, sl],
                        preferred_element_type=jnp.float32)            # (TQ, Dh)
        ctx_ref[:, sl] = ctx_h.astype(ctx_ref.dtype)

    # Single K=D output projection (full MXU depth) instead of num_heads K=Dh ones.
    hidden = jnp.dot(ctx_ref[...], wo_ref[...],
                     preferred_element_type=jnp.float32)                # (TQ, D)
    hidden = hidden + bo_ref[...] + x                                   # residual add (f32)

    # BertLayerNorm (TF-style: eps inside the sqrt), f32 math, rsqrt on EUP.
    u = jnp.mean(hidden, axis=-1, keepdims=True)
    diff = hidden - u
    s = jnp.mean(diff * diff, axis=-1, keepdims=True)
    normed = diff * jax.lax.rsqrt(s + eps)
    out = gamma_ref[...] * normed + beta_ref[...]
    out_ref[0] = out.astype(out_ref.dtype)


def bert_attention(x, attention_mask, params, *, num_heads, eps=1e-12,
                   q_block=512, row_block=1024):
    """x: (N, L, D) f32, attention_mask: (N, L, L) with 1 = attend, 0 = masked."""
    N, L, D = x.shape
    assert D % num_heads == 0
    Dh = D // num_heads
    NL = N * L

    # --- fold 1/sqrt(Dh) into the Q weights/bias; fuse QKV weights (trace time) ---
    scale = 1.0 / math.sqrt(Dh)
    wqkv = jnp.concatenate([params["wq"] * scale, params["wk"], params["wv"]],
                           axis=1).astype(jnp.bfloat16)                 # (D, 3D)
    bqkv = jnp.concatenate([params["bq"] * scale, params["bk"], params["bv"]],
                           axis=1).astype(jnp.float32)                  # (1, 3D)

    # ---------------- Kernel A: fused QKV projection ----------------
    TM, NL_pad = _tile_and_pad(NL, row_block)
    x_rows = x.reshape(NL, D)
    if NL_pad != NL:
        x_rows = jnp.pad(x_rows, ((0, NL_pad - NL), (0, 0)))

    flops_a = 2 * NL_pad * D * (3 * D)
    bytes_a = NL_pad * D * 4 + D * 3 * D * 2 + 3 * D * 4 + 3 * NL_pad * D * 2

    # NOTE(megacore, v7x): for big problems pick row_block so NL_pad//TM is even.
    q, k, v = pl.pallas_call(
        _qkv_kernel,
        out_shape=tuple(jax.ShapeDtypeStruct((NL_pad, D), jnp.bfloat16) for _ in range(3)),
        grid_spec=pltpu.PrefetchScalarGridSpec(
            num_scalar_prefetch=0,
            grid=(NL_pad // TM,),
            in_specs=[pl.BlockSpec((TM, D), lambda i: (i, 0)),
                      _const_spec((D, 3 * D), lambda i: (0, 0)),
                      _const_spec((1, 3 * D), lambda i: (0, 0))],
            out_specs=tuple(pl.BlockSpec((TM, D), lambda i: (i, 0)) for _ in range(3)),
        ),
        compiler_params=pltpu.CompilerParams(
            dimension_semantics=("parallel",),
            vmem_limit_bytes=_vmem_limit()),
        cost_estimate=pl.CostEstimate(flops=flops_a, transcendentals=0,
                                      bytes_accessed=bytes_a),
    )(x_rows, wqkv, bqkv)

    if NL_pad != NL:
        q, k, v = q[:NL], k[:NL], v[:NL]
    q = q.reshape(N, L, D)
    k = k.reshape(N, L, D)
    v = v.reshape(N, L, D)

    # ------------- Kernel B: attention + output dense + residual + LayerNorm -------------
    TQ, L_pad = _tile_and_pad(L, q_block)
    q_in, x_in, mask_in = q, x, attention_mask.astype(jnp.float32)
    if L_pad != L:
        pad3 = ((0, 0), (0, L_pad - L), (0, 0))
        q_in = jnp.pad(q_in, pad3)            # padded query rows sliced off after
        x_in = jnp.pad(x_in, pad3)
        mask_in = jnp.pad(mask_in, pad3)      # padded rows -> all-masked -> finite softmax

    wo = params["wo"].astype(jnp.bfloat16)
    kernel = functools.partial(_attn_out_ln_kernel,
                               num_heads=num_heads, head_size=Dh, eps=eps)

    q_spec = pl.BlockSpec((1, TQ, D), lambda n, qi: (n, qi, 0))
    # NOTE(v7x, long L): kv_spec only changes block on the n axis; for L >= 2k either
    # single-buffer it (pl.Buffered(1)) or add an L grid axis with online softmax.
    kv_spec = pl.BlockSpec((1, L, D), lambda n, qi: (n, 0, 0))
    mask_spec = pl.BlockSpec((1, TQ, L), lambda n, qi: (n, qi, 0))
    xres_spec = pl.BlockSpec((1, TQ, D), lambda n, qi: (n, qi, 0))
    wo_spec = _const_spec((D, D), lambda n, qi: (0, 0))
    vec_spec = _const_spec((1, D), lambda n, qi: (0, 0))
    out_spec = pl.BlockSpec((1, TQ, D), lambda n, qi: (n, qi, 0))

    flops_b = N * (4 * L_pad * L * D + 2 * L_pad * D * D)
    trans_b = N * num_heads * L_pad * L
    bytes_b = (N * L_pad * D * 2 + 2 * N * L * D * 2 + N * L_pad * L * 4
               + N * L_pad * D * 4 + D * D * 2 + 3 * D * 4 + N * L_pad * D * 4)

    out = pl.pallas_call(
        kernel,
        out_shape=jax.ShapeDtypeStruct((N, L_pad, D), jnp.float32),
        grid_spec=pltpu.PrefetchScalarGridSpec(
            num_scalar_prefetch=0,
            grid=(N, L_pad // TQ),
            in_specs=[q_spec, kv_spec, kv_spec, mask_spec, xres_spec,
                      wo_spec, vec_spec, vec_spec, vec_spec],
            out_specs=out_spec,
            scratch_shapes=[pltpu.VMEM((TQ, D), jnp.bfloat16)],   # context buffer
        ),
        compiler_params=pltpu.CompilerParams(
            dimension_semantics=("parallel", "parallel"),
            vmem_limit_bytes=_vmem_limit()),
        cost_estimate=pl.CostEstimate(flops=flops_b, transcendentals=trans_b,
                                      bytes_accessed=bytes_b),
    )(q_in, k, v, mask_in, x_in, wo,
      params["bo"].astype(jnp.float32),
      params["gamma"].astype(jnp.float32),
      params["beta"].astype(jnp.float32))

    if L_pad != L:
        out = out[:, :L]
    return out


# ---------------------------------------------------------------------------
# Pure-JAX references (f32) mirroring the PyTorch forward passes.
# ---------------------------------------------------------------------------
def _layer_norm_reference(x, w, b, eps=1e-12):
    u = x.mean(-1, keepdims=True)
    s = ((x - u) ** 2).mean(-1, keepdims=True)
    return w * ((x - u) / jnp.sqrt(s + eps)) + b


def _attention_reference(x, attention_mask, params, *, num_heads, eps=1e-12):
    N, L, D = x.shape
    Dh = D // num_heads
    bias = (1.0 - attention_mask[:, None, :, :]) * -10000.0

    def proj(x, w, b):
        return jnp.einsum('nld,de->nle', x, w) + b

    def heads(t):
        return t.reshape(N, L, num_heads, Dh).transpose(0, 2, 1, 3)

    q = heads(proj(x, params["wq"], params["bq"][0]))
    k = heads(proj(x, params["wk"], params["bk"][0]))
    v = heads(proj(x, params["wv"], params["bv"][0]))

    scores = jnp.einsum('nhqd,nhkd->nhqk', q, k) / math.sqrt(Dh) + bias
    probs = jax.nn.softmax(scores, axis=-1)
    ctx = jnp.einsum('nhqk,nhkd->nhqd', probs, v)
    ctx = ctx.transpose(0, 2, 1, 3).reshape(N, L, D)

    hidden = jnp.einsum('nld,de->nle', ctx, params["wo"]) + params["bo"][0]
    hidden = hidden + x
    return _layer_norm_reference(hidden, params["gamma"][0], params["beta"][0], eps)


def init_params(key, hidden_size):
    D = hidden_size
    ks = jax.random.split(key, 8)
    scale = 0.02
    return {
        # Linear weights stored as (D_in, D_out) == torch weight transposed.
        "wq": scale * jax.random.normal(ks[0], (D, D), jnp.float32),
        "bq": scale * jax.random.normal(ks[1], (1, D), jnp.float32),
        "wk": scale * jax.random.normal(ks[2], (D, D), jnp.float32),
        "bk": scale * jax.random.normal(ks[3], (1, D), jnp.float32),
        "wv": scale * jax.random.normal(ks[4], (D, D), jnp.float32),
        "bv": scale * jax.random.normal(ks[5], (1, D), jnp.float32),
        "wo": scale * jax.random.normal(ks[6], (D, D), jnp.float32),
        "bo": scale * jax.random.normal(ks[7], (1, D), jnp.float32),
        "gamma": jnp.ones((1, D), jnp.float32),
        "beta": jnp.zeros((1, D), jnp.float32),
    }


if __name__ == "__main__":
    N, L, D, H = 2, 8, 32, 4

    key = jax.random.PRNGKey(0)
    k_x, k_m, k_p, k_g, k_b = jax.random.split(key, 5)

    x = jax.random.normal(k_x, (N, L, D), jnp.float32)
    attention_mask = (jax.random.uniform(k_m, (N, L, L)) > 0.2).astype(jnp.float32)
    params = init_params(k_p, D)

    # --- 1) standalone BertLayerNorm kernel (the spec module) ---
    ln_w = 1.0 + 0.1 * jax.random.normal(k_g, (D,), jnp.float32)
    ln_b = 0.1 * jax.random.normal(k_b, (D,), jnp.float32)
    ln_out = jax.block_until_ready(bert_layer_norm(x, ln_w, ln_b))
    ln_ref = _layer_norm_reference(x, ln_w, ln_b)
    assert ln_out.shape == x.shape
    assert jnp.allclose(ln_out, ln_ref, atol=1e-4, rtol=1e-4), "LayerNorm mismatch"

    # --- 1b) exercise the non-divisible (padded) tiling path ---
    x_odd = jax.random.normal(k_x, (3, 5, D), jnp.float32)
    ln_out_odd = jax.block_until_ready(bert_layer_norm(x_odd, ln_w, ln_b, max_rows=8))
    ln_ref_odd = _layer_norm_reference(x_odd, ln_w, ln_b)
    assert ln_out_odd.shape == x_odd.shape
    assert jnp.allclose(ln_out_odd, ln_ref_odd, atol=1e-4, rtol=1e-4), "padded LayerNorm mismatch"

    # --- 2) fused attention + BertLayerNorm kernel (bf16 matmuls, f32 accumulation) ---
    out = jax.block_until_ready(bert_attention(x, attention_mask, params, num_heads=H))
    ref = _attention_reference(x, attention_mask, params, num_heads=H)
    assert out.shape == (N, L, D)
    assert jnp.allclose(out, ref, atol=2e-2, rtol=2e-2), "attention mismatch vs reference"

    print("KERNEL_OK")
</pallas_src>

<mosaic_0001>
module attributes {stable_mosaic.version = 11 : i64} {
  func.func @k(%arg0: i32, %arg1: memref<8x128xf32, #tpu.memory_space<vmem>>, %arg2: memref<8x128xf32, #tpu.memory_space<vmem>>, %arg3: memref<8x128xf32, #tpu.memory_space<vmem>>) attributes {dimension_semantics = [#tpu.dimension_semantics<arbitrary>], iteration_bounds = array<i64: 1>, scalar_prefetch = 0 : i64, scratch_operands = 0 : i64, tpu.core_type = #tpu.core_type<tc>, window_params = [{pipeline_mode = #tpu.pipeline_mode<synchronous>, transform_indices = @transform_0, window_bounds = array<i64: 8, 128>}, {pipeline_mode = #tpu.pipeline_mode<synchronous>, transform_indices = @transform_1, window_bounds = array<i64: 8, 128>}, {pipeline_mode = #tpu.pipeline_mode<synchronous>, transform_indices = @transform_2, window_bounds = array<i64: 8, 128>}]} {
    %c0 = arith.constant 0 : index
    %c0_0 = arith.constant 0 : index
    %0 = vector.load %arg2[%c0, %c0_0] : memref<8x128xf32, #tpu.memory_space<vmem>>, vector<8x128xf32>
    %c0_1 = arith.constant 0 : index
    %c0_2 = arith.constant 0 : index
    %1 = vector.load %arg1[%c0_1, %c0_2] : memref<8x128xf32, #tpu.memory_space<vmem>>, vector<8x128xf32>
    %2 = arith.addf %0, %1 : vector<8x128xf32>
    %c0_3 = arith.constant 0 : index
    %c0_4 = arith.constant 0 : index
    %3 = vector.load %arg3[%c0_3, %c0_4] : memref<8x128xf32, #tpu.memory_space<vmem>>, vector<8x128xf32>
    tpu.vector_store %arg3[%c0_3, %c0_4], %2 {strides = array<i32>} : memref<8x128xf32, #tpu.memory_space<vmem>>, vector<8x128xf32>,
    return
  }
  func.func @transform_0(%arg0: i32) -> (i32, i32) {
    %c0_i32 = arith.constant 0 : i32
    %c0_i32_0 = arith.constant 0 : i32
    %c0_i32_1 = arith.constant 0 : i32
    return %c0_i32, %c0_i32_0 : i32, i32
  }
  func.func @transform_1(%arg0: i32) -> (i32, i32) {
    %c0_i32 = arith.constant 0 : i32
    %c0_i32_0 = arith.constant 0 : i32
    %c0_i32_1 = arith.constant 0 : i32
    return %c0_i32, %c0_i32_0 : i32, i32
  }
  func.func @transform_2(%arg0: i32) -> (i32, i32) {
    %c0_i32 = arith.constant 0 : i32
    %c0_i32_0 = arith.constant 0 : i32
    %c0_i32_1 = arith.constant 0 : i32
    return %c0_i32, %c0_i32_0 : i32, i32
  }
}

module attributes {stable_mosaic.version = 11 : i64} {
  func.func @_layer_norm_kernel(%arg0: i32, %arg1: memref<16x32xf32, #tpu.memory_space<vmem>>, %arg2: memref<1x32xf32, #tpu.memory_space<vmem>>, %arg3: memref<1x32xf32, #tpu.memory_space<vmem>>, %arg4: memref<16x32xf32, #tpu.memory_space<vmem>>) attributes {dimension_semantics = [#tpu.dimension_semantics<parallel>], iteration_bounds = array<i64: 1>, scalar_prefetch = 0 : i64, scratch_operands = 0 : i64, tpu.core_type = #tpu.core_type<tc>, window_params = [{transform_indices = @transform_0, window_bounds = array<i64: 16, 32>}, {pipeline_mode = #tpu.pipeline_mode<synchronous>, transform_indices = @transform_1, window_bounds = array<i64: 1, 32>}, {pipeline_mode = #tpu.pipeline_mode<synchronous>, transform_indices = @transform_2, window_bounds = array<i64: 1, 32>}, {transform_indices = @transform_3, window_bounds = array<i64: 16, 32>}]} {
    %c0 = arith.constant 0 : index
    %c0_0 = arith.constant 0 : index
    %0 = vector.load %arg1[%c0, %c0_0] : memref<16x32xf32, #tpu.memory_space<vmem>>, vector<16x32xf32>
    %cst = arith.constant dense<0.000000e+00> : vector<16xf32>
    %1 = vector.multi_reduction <add>, %0, %cst [1] : vector<16x32xf32> to vector<16xf32>
    %2 = vector.shape_cast %1 : vector<16xf32> to vector<16x1xf32>
    %cst_1 = arith.constant 3.200000e+01 : f32
    %3 = vector.broadcast %cst_1 : f32 to vector<16x1xf32>
    %4 = arith.divf %2, %3 : vector<16x1xf32>
    %5 = vector.broadcast %4 : vector<16x1xf32> to vector<16x32xf32>
    %6 = arith.subf %0, %5 : vector<16x32xf32>
    %7 = arith.mulf %6, %6 : vector<16x32xf32>
    %cst_2 = arith.constant dense<0.000000e+00> : vector<16xf32>
    %8 = vector.multi_reduction <add>, %7, %cst_2 [1] : vector<16x32xf32> to vector<16xf32>
    %9 = vector.shape_cast %8 : vector<16xf32> to vector<16x1xf32>
    %cst_3 = arith.constant 3.200000e+01 : f32
    %10 = vector.broadcast %cst_3 : f32 to vector<16x1xf32>
    %11 = arith.divf %9, %10 : vector<16x1xf32>
    %cst_4 = arith.constant 9.99999996E-13 : f32
    %12 = vector.broadcast %cst_4 : f32 to vector<16x1xf32>
    %13 = arith.addf %11, %12 : vector<16x1xf32>
    %14 = math.rsqrt %13 : vector<16x1xf32>
    %15 = vector.broadcast %14 : vector<16x1xf32> to vector<16x32xf32>
    %16 = arith.mulf %6, %15 : vector<16x32xf32>
    %c0_5 = arith.constant 0 : index
    %c0_6 = arith.constant 0 : index
    %17 = vector.load %arg2[%c0_5, %c0_6] : memref<1x32xf32, #tpu.memory_space<vmem>>, vector<1x32xf32>
    %18 = vector.broadcast %17 : vector<1x32xf32> to vector<16x32xf32>
    %19 = arith.mulf %18, %16 : vector<16x32xf32>
    %c0_7 = arith.constant 0 : index
    %c0_8 = arith.constant 0 : index
    %20 = vector.load %arg3[%c0_7, %c0_8] : memref<1x32xf32, #tpu.memory_space<vmem>>, vector<1x32xf32>
    %21 = vector.broadcast %20 : vector<1x32xf32> to vector<16x32xf32>
    %22 = arith.addf %19, %21 : vector<16x32xf32>
    %c0_9 = arith.constant 0 : index
    %c0_10 = arith.constant 0 : index
    %23 = vector.load %arg4[%c0_9, %c0_10] : memref<16x32xf32, #tpu.memory_space<vmem>>, vector<16x32xf32>
    tpu.vector_store %arg4[%c0_9, %c0_10], %22 {strides = array<i32>} : memref<16x32xf32, #tpu.memory_space<vmem>>, vector<16x32xf32>,
    return
  }
  func.func @transform_0(%arg0: i32) -> (i32, i32) {
    %c0_i32 = arith.constant 0 : i32
    %c0_i32_0 = arith.constant 0 : i32
    return %arg0, %c0_i32 : i32, i32
  }
  func.func @transform_1(%arg0: i32) -> (i32, i32) {
    %c0_i32 = arith.constant 0 : i32
    %c0_i32_0 = arith.constant 0 : i32
    %c0_i32_1 = arith.constant 0 : i32
    return %c0_i32, %c0_i32_0 : i32, i32
  }
  func.func @transform_2(%arg0: i32) -> (i32, i32) {
    %c0_i32 = arith.constant 0 : i32
    %c0_i32_0 = arith.constant 0 : i32
    %c0_i32_1 = arith.constant 0 : i32
    return %c0_i32, %c0_i32_0 : i32, i32
  }
  func.func @transform_3(%arg0: i32) -> (i32, i32) {
    %c0_i32 = arith.constant 0 : i32
    %c0_i32_0 = arith.constant 0 : i32
    return %arg0, %c0_i32 : i32, i32
  }
}

</mosaic_0001>

<bundles_post_ra>
// kernel: tpu_custom_call.1
= control target key start
LH: loop header
LB: loop body
LE: loop exit
PB: predicated region body
PF: predicated region fallthrough
CT: control target
= control target key end

     0   :  { %7 = vsyncpa [#allocation3], 0  ;;  %s170_s0 = inlined_call_operand.hbm [shape: f32[8,128], index: 0, kind: input, shape index: {}]   ;;  %s171_s1 = inlined_call_operand.hbm [shape: f32[8,128], index: 1, kind: input, shape index: {}]   ;;  %s172_s2 = inlined_call_operand.hbm [shape: f32[8,128], index: 2, kind: output, shape index: {}]  }
   0x1   :  { %8 = vsyncpa [#allocation6], 0 }
   0x2   :  { %9 = vsyncpa [#allocation4], 0  ;;  %s15_s11 = sshll.u32 %s170_s0, 4  ;;  %s143_s12 = smov [#allocation2]   ;;  %s16_s11 = int_to_ptr.hbm [resolvable:$true] %s15_s11 }
   0x3   :  { %s17_s13 = sshll.u32 %s143_s12, 4  ;;  %s26_s16 = sshll.u32 %s171_s1, 4  ;;  %s18_s13 = int_to_ptr.vmem [resolvable:$true] %s17_s13  ;;  %s27_s16 = int_to_ptr.hbm [resolvable:$true] %s26_s16 }
   0x4   :  { %20 = dma.hbm_to_vmem [thread:$0]  %s16_s11, 128, %s18_s13, [#allocation3]  }
   0x5   :  { %s144_s17 = smov [#allocation5]  }
   0x6   :  { %s28_s18 = sshll.u32 %s144_s17, 4  ;;  %s29_s18 = int_to_ptr.vmem [resolvable:$true] %s28_s18 }
   0x7   :  { %31 = dma.hbm_to_vmem [thread:$0]  %s27_s16, 128, %s29_s18, [#allocation6]  }
   0x8   :  { %137 = dma.done.wait [#allocation3], 128  }
   0x9   :  { %138 = vsyncadd [#allocation3], 4294967168 }
   0xa   :  { %139 = dma.done.wait [#allocation6], 128  }
   0xb   :  { %140 = vsyncadd [#allocation6], 4294967168  ;;  %s145_s19 = smov [#allocation7]   ;;  %s51_s22 = sshll.u32 %s172_s2, 4  ;;  %v40_v0 = vld [vmem:[#allocation5] sm:$0xff]  ;;  %v41_v1 = vld [vmem:[#allocation2] sm:$0xff]  ;;  %s52_s22 = int_to_ptr.hbm [resolvable:$true] %s51_s22 }
   0xc   :  { %s49_s0 = sshll.u32 %s145_s19, 4  ;;  %v42_v2 = vadd.f32 %v41_v1, %v40_v0  ;;  %s50_s0 = int_to_ptr.vmem [resolvable:$true] %s49_s0 }
   0xe   :  { %43 = vst [vmem:[#allocation7] sm:$0xff] %v42_v2 }
   0xf   :  { %54 = dma.vmem_to_hbm [thread:$0]  %s50_s0, 128, %s52_s22, [#allocation4]  }
  0x10   :  { %141 = dma.done.wait [#allocation4], 128  }
  0x11   :  { %142 = vsyncadd [#allocation4], 4294967168 }
  0x12   :  { %59 = vsyncpa [#allocation3], 1 }
  0x13   :  { %60 = vsyncpa [#allocation6], 1 }
  0x14   :  { %61 = vsyncpa [#allocation4], 1 }

// kernel: tpu_custom_call.1
= control target key start
LH: loop header
LB: loop body
LE: loop exit
PB: predicated region body
PF: predicated region fallthrough
CT: control target
= control target key end

     0   :  { %8 = vsyncpa [#allocation3], 0  ;;  %s275_s0 = inlined_call_operand.hbm [shape: f32[16,32], index: 0, kind: input, shape index: {}]   ;;  %s276_s1 = inlined_call_operand.hbm [shape: f32[1,32], index: 1, kind: input, shape index: {}]   ;;  %s277_s2 = inlined_call_operand.vmem [shape: f32[1,32], index: 2, kind: input, shape index: {}]   ;;  %s278_s3 = inlined_call_operand.hbm [shape: f32[16,32], index: 3, kind: output, shape index: {}]  }
   0x1   :  { %9 = vsyncpa [#allocation6], 0 }
   0x2   :  { %10 = vsyncpa [#allocation4], 0  ;;  %s15_s14 = sshll.u32 %s275_s0, 4  ;;  %s225_s15 = smov [#allocation2]   ;;  %s16_s14 = int_to_ptr.hbm [resolvable:$true] %s15_s14 }
   0x3   :  { %s17_s16 = sshll.u32 %s225_s15, 4  ;;  %s29_s19 = sshll.u32 %s276_s1, 4  ;;  %s18_s16 = int_to_ptr.vmem [resolvable:$true] %s17_s16  ;;  %s30_s19 = int_to_ptr.hbm [resolvable:$true] %s29_s19 }
   0x4   :  { %s226_s20 = smov 128   ;;  %s227_s21 = smov 8  }
   0x5   :  { %23 = dma.hbm_to_vmem [thread:$0]  %s16_s14, 256, %s18_s16, [#allocation3], %s226_s20, %s226_s20, %s227_s21  }
   0x6   :  { %s228_s22 = smov [#allocation5]  }
   0x7   :  { %s31_s23 = sshll.u32 %s228_s22, 4  ;;  %s32_s23 = int_to_ptr.vmem [resolvable:$true] %s31_s23 }
   0x8   :  { %34 = dma.hbm_to_vmem [thread:$0]  %s30_s19, 16, %s32_s23, [#allocation6]  }
   0x9   :  { %219 = dma.done.wait [#allocation3], 256  }
   0xa   :  { %220 = vsyncadd [#allocation3], 4294967040 }
   0xb   :  { %221 = dma.done.wait [#allocation6], 16  }
   0xc   :  { %222 = vsyncadd [#allocation6], 4294967280  ;;  %vm47_vm0 = vcmask 261120   ;;  %v45_v0 = vld [vmem:[#allocation2] sm:$0xff]  ;;  %v46_v2 = vld [vmem:[#allocation2 + $0x8] sm:$0xff]  ;;  %v229_v4 = vmov 32.0  }
   0xd   :  { %v48_v1 = vsel %vm47_vm0, %v45_v0, 0.0  ;;  %v51_v3 = vsel %vm47_vm0, %v46_v2, 0.0  ;;  %141 = vrcp.f32 %v229_v4  ;;  %v139_v35 = vld [vmem:[#allocation5] ss:$0 sm:$0xff]  ;;  %v140_v39 = vld [vmem:[%s277_s2] ss:$0 sm:$0xff] }
   0xe   :  { %49 = vadd.xlane.f32.xlu0 %v48_v1  ;;  %s230_s24 = smov [#allocation7]   ;;  %s119_s28 = sshll.u32 %s278_s3, 4  ;;  %s120_s28 = int_to_ptr.hbm [resolvable:$true] %s119_s28 }
   0xf   :  { %s117_s25 = sshll.u32 %s230_s24, 4  ;;  %s118_s25 = int_to_ptr.vmem [resolvable:$true] %s117_s25 }
  0x13   :  { %v142_v5 = vpop.eup %141 }
  0x14   :  { %v55_v6 = vmul.f32 32.0, %v142_v5  ;;  %vm59_vm1 = vweird.f32 %v142_v5 }
  0x16   :  { %52 = vadd.xlane.f32.xlu0 %v51_v3  ;;  %v56_v7 = vsub.f32 1.0, %v55_v6 }
  0x18   :  { %v57_v8 = vmul.f32 %v142_v5, %v56_v7 }
  0x1a   :  { %v58_v9 = vadd.f32 %v142_v5, %v57_v8 }
  0x1c   :  { %v60_v10 = vsel %vm59_vm1, %v142_v5, %v58_v9 }
  0x81   :  { %v50_v11 = vpop.xlane.xlu0 %49 }
  0x82   :  { %v61_v12 = vmul.f32 %v60_v10, %v50_v11 }
  0x84   :  { %v63_v13 = vsub.f32 %v45_v0, %v61_v12 }
  0x86   :  { %v65_v14 = vmul.f32 %v63_v13, %v63_v13 }
  0x88   :  { %v67_v15 = vsel %vm47_vm0, %v65_v14, 0.0 }
  0x89   :  { %68 = vadd.xlane.f32.xlu1 %v67_v15  ;;  %v53_v16 = vpop.xlane.xlu0 %52 }
  0x8a   :  { %v62_v17 = vmul.f32 %v60_v10, %v53_v16 }
  0x8c   :  { %v64_v18 = vsub.f32 %v46_v2, %v62_v17 }
  0x8e   :  { %v66_v19 = vmul.f32 %v64_v18, %v64_v18 }
  0x90   :  { %v70_v20 = vsel %vm47_vm0, %v66_v19, 0.0 }
  0x91   :  { %71 = vadd.xlane.f32.xlu1 %v70_v20 }
  0xfc   :  { %v69_v21 = vpop.xlane.xlu1 %68 }
  0xfd   :  { %v73_v22 = vmul.f32 %v69_v21, %v60_v10 }
  0xff   :  { %v75_v23 = vadd.f32 1e-12, %v73_v22 }
 0x101   :  { %143 = vrsqrt.f32 %v75_v23  ;;  %vm83_vm3 = vweird.f32 %v75_v23 }
 0x104   :  { %v72_v24 = vpop.xlane.xlu1 %71 }
 0x105   :  { %v74_v25 = vmul.f32 %v72_v24, %v60_v10 }
 0x107   :  { %v144_v26 = vpop.eup %143  ;;  %v76_v27 = vadd.f32 1e-12, %v74_v25 }
 0x108   :  { %v78_v28 = vmul.f32 %v144_v26, %v75_v23  ;;  %vm84_vm2 = vweird.f32 %v144_v26 }
 0x109   :  { %145 = vrsqrt.f32 %v76_v27  ;;  %vm85_vm4 = vmor %vm83_vm3, %vm84_vm2  ;;  %vm93_vm6 = vweird.f32 %v76_v27 }
 0x10a   :  { %v79_v29 = vmul.f32 %v144_v26, %v78_v28 }
 0x10c   :  { %v80_v30 = vmul.f32 0.5, %v79_v29 }
 0x10e   :  { %v81_v31 = vsub.f32 1.5, %v80_v30 }
 0x10f   :  { %v146_v32 = vpop.eup %145 }
 0x110   :  { %v82_v33 = vmul.f32 %v144_v26, %v81_v31  ;;  %v88_v34 = vmul.f32 %v146_v32, %v76_v27  ;;  %vm94_vm5 = vweird.f32 %v146_v32 }
 0x111   :  { %vm95_vm7 = vmor %vm93_vm6, %vm94_vm5 }
 0x112   :  { %v86_v36 = vsel %vm85_vm4, %v144_v26, %v82_v33  ;;  %v89_v37 = vmul.f32 %v146_v32, %v88_v34 }
 0x113   :  { %v97_v38 = vmul.f32 %v86_v36, %v63_v13 }
 0x114   :  { %v90_v40 = vmul.f32 0.5, %v89_v37 }
 0x115   :  { %v103_v41 = vmul.f32 %v139_v35, %v97_v38 }
 0x116   :  { %v91_v42 = vsub.f32 1.5, %v90_v40 }
 0x117   :  { %v109_v43 = vadd.f32 %v140_v39, %v103_v41 }
 0x118   :  { %v92_v44 = vmul.f32 %v146_v32, %v91_v42 }
 0x119   :  { %111 = vst.msk [vmem:[#allocation7] sm:$0xff] %vm47_vm0, %v109_v43 }
 0x11a   :  { %v96_v45 = vsel %vm95_vm7, %v146_v32, %v92_v44 }
 0x11b   :  { %v98_v46 = vmul.f32 %v96_v45, %v64_v18 }
 0x11d   :  { %v104_v47 = vmul.f32 %v139_v35, %v98_v46 }
 0x11f   :  { %v110_v48 = vadd.f32 %v140_v39, %v104_v47 }
 0x121   :  { %112 = vst.msk [vmem:[#allocation7 + $0x8] sm:$0xff] %vm47_vm0, %v110_v48 }
 0x122   :  { %125 = dma.vmem_to_hbm [thread:$0]  %s118_s25, 256, %s120_s28, [#allocation4], %s226_s20, %s226_s20, %s227_s21  }
 0x123   :  { %223 = dma.done.wait [#allocation4], 256  }
 0x124   :  { %224 = vsyncadd [#allocation4], 4294967040 }
 0x125   :  { %130 = vsyncpa [#allocation3], 1 }
 0x126   :  { %131 = vsyncpa [#allocation6], 1 }
 0x127   :  { %132 = vsyncpa [#allocation4], 1 }

</bundles_post_ra>
